<compile_context>
chip_gen: v7x
topology: tpu7x:2x2x1
jax: 0.10.0
libtpu: 0.0.40
codegen_flags: <defaults>
</compile_context>

<pallas_src>
import functools
import math

import jax
import jax.numpy as jnp
import numpy as np
from jax.experimental import pallas as pl
from jax.experimental.pallas import tpu as pltpu


def _round_up(a, b):
    return ((a + b - 1) // b) * b


def _tpu_generation():
    """(vmem_capacity_bytes, two_tensorcores, has_bf16_vpu) with safe fallbacks."""
    vmem_cap = 64 << 20            # conservative default (v7x per-TC VMEM)
    kind = ""
    try:
        vmem_cap = int(pltpu.get_tpu_info().vmem_capacity_bytes)
    except Exception:
        pass
    try:
        kind = jax.devices()[0].device_kind.lower()
    except Exception:
        pass
    two_tc = ("v7" in kind) or ("7x" in kind)
    bf16_vpu = ("v6" in kind) or two_tc           # v5e has no bf16 VPU
    return vmem_cap, two_tc, bf16_vpu


def _choose_rows_tile(rows, width, in_bytes, out_bytes, tile_budget, two_tc):
    """Rows per tile from a VMEM byte budget (no arbitrary row caps)."""
    # Sublane packing unit: 8 rows/vreg at 32-bit, 16 at 16-bit, 32 at 8-bit.
    sub = 8 * max(1, 4 // max(1, min(in_bytes, out_bytes)))
    if rows <= sub:
        # Single block equal to the full row extent (allowed even if < 8 rows).
        return max(int(rows), 1)
    # Per-row working set: double-buffered input + output tiles and ~2 f32 temps
    # (one-pass moments keep few full-size intermediates live; trust fusion).
    per_row = width * (2 * in_bytes + 2 * out_bytes + 2 * 4)
    tile = max(sub, (tile_budget // max(per_row, 1)) // sub * sub)
    # Step-count cap: keep both v7x TensorCores busy / hide the single-TC pipeline
    # prologue, but never shrink the input tile below ~4 MiB (DMA-efficiency floor).
    min_steps = 8 if two_tc else 4
    cap_tile = max(sub, _round_up(pl.cdiv(rows, min_steps), sub))
    floor_tile = _round_up(pl.cdiv(4 << 20, width * in_bytes), sub)
    tile = min(tile, max(cap_tile, floor_tile))
    tile = min(tile, _round_up(rows, sub))
    tile = max(tile, sub)
    if two_tc:
        steps = pl.cdiv(rows, tile)
        if steps > 1 and steps % 2 == 1:          # balance work across the two TCs
            cand = max(sub, _round_up(pl.cdiv(rows, steps + 1), sub))
            if pl.cdiv(rows, cand) % 2 == 0:
                tile = cand
    return int(tile)


def _ln_kernel(x_ref, w_ref, b_ref, o_ref, *, eps, inv_h, compute_dtype):
    # x_ref: (rows_tile, hidden); w_ref/b_ref: (1, hidden) in compute_dtype (resident).
    x = x_ref[...]
    x32 = x.astype(jnp.float32)
    u = jnp.sum(x32, axis=-1, keepdims=True) * inv_h           # E[x]    (f32)
    s2 = jnp.sum(x32 * x32, axis=-1, keepdims=True) * inv_h    # E[x^2]  (f32)
    var = jnp.maximum(s2 - u * u, 0.0)                         # guard cancellation
    inv = jax.lax.rsqrt(var + eps)                             # EUP, eps inside sqrt
    xc = x.astype(compute_dtype) - u.astype(compute_dtype)
    o_ref[...] = (xc * inv.astype(compute_dtype) * w_ref[...] + b_ref[...]).astype(o_ref.dtype)


def _ln_packed_kernel(x_ref, m_ref, w_ref, b_ref, o_ref, *, eps, compute_dtype):
    # x_ref: (rows_tile, P) where each row packs g logical rows of width hidden.
    # m_ref: (P, P) block-diagonal matrix with 1/hidden inside each segment (resident).
    x = x_ref[...]
    x32 = x.astype(jnp.float32)
    m = m_ref[...]
    u = jnp.dot(x32, m, preferred_element_type=jnp.float32)         # segment means (bcast)
    s2 = jnp.dot(x32 * x32, m, preferred_element_type=jnp.float32)  # segment E[x^2] (bcast)
    var = jnp.maximum(s2 - u * u, 0.0)
    inv = jax.lax.rsqrt(var + eps)
    xc = x.astype(compute_dtype) - u.astype(compute_dtype)
    o_ref[...] = (xc * inv.astype(compute_dtype) * w_ref[...] + b_ref[...]).astype(o_ref.dtype)


@functools.partial(jax.jit, static_argnames=("eps",))
def layernorm(x, weight, bias, eps=1e-12):
    """x: (..., hidden). weight, bias: (hidden,). Returns same shape/dtype as x."""
    orig_shape = x.shape
    hidden = orig_shape[-1]
    rows = math.prod(orig_shape[:-1])
    if rows == 0 or hidden == 0:
        return x

    vmem_cap, two_tc, bf16_vpu = _tpu_generation()
    vmem_limit = min(vmem_cap * 3 // 4, 100 << 20)     # scoped-VMEM request (gen-aware)
    tile_budget = vmem_limit // 2                      # conservative working-set target

    compute_dtype = jnp.bfloat16 if (x.dtype == jnp.bfloat16 and bf16_vpu) else jnp.float32
    in_b = out_b = jnp.dtype(x.dtype).itemsize

    x2 = x.reshape(rows, hidden)
    g = (128 // hidden) if (hidden < 128 and 128 % hidden == 0) else 1
    packed = (g > 1) and (rows % g == 0)
    # TODO(synk): rows not divisible by g (or hidden not dividing 128) falls back to the
    # lane-masked path below instead of a padded packed layout.

    compiler_params = pltpu.CompilerParams(
        dimension_semantics=("parallel",),
        vmem_limit_bytes=int(vmem_limit),
    )

    if packed:
        width = g * hidden                       # == 128: fully lane-dense loads/stores
        rows_k = rows // g
        x2 = x2.reshape(rows_k, width)
        w2 = jnp.tile(weight.astype(compute_dtype), g).reshape(1, width)
        b2 = jnp.tile(bias.astype(compute_dtype), g).reshape(1, width)
        seg = np.repeat(np.arange(g), hidden)
        m = jnp.asarray((seg[:, None] == seg[None, :]).astype(np.float32) / float(hidden))
        rows_tile = _choose_rows_tile(rows_k, width, in_b, out_b, tile_budget, two_tc)
        grid = (pl.cdiv(rows_k, rows_tile),)
        out = pl.pallas_call(
            functools.partial(_ln_packed_kernel, eps=float(eps), compute_dtype=compute_dtype),
            out_shape=jax.ShapeDtypeStruct((rows_k, width), x.dtype),
            grid_spec=pltpu.PrefetchScalarGridSpec(
                num_scalar_prefetch=0,
                grid=grid,
                in_specs=[
                    pl.BlockSpec((rows_tile, width), lambda i: (i, 0)),
                    pl.BlockSpec((width, width), lambda i: (0, 0)),   # segment matrix: resident
                    pl.BlockSpec((1, width), lambda i: (0, 0)),       # weight: resident
                    pl.BlockSpec((1, width), lambda i: (0, 0)),       # bias:   resident
                ],
                out_specs=pl.BlockSpec((rows_tile, width), lambda i: (i, 0)),
            ),
            compiler_params=compiler_params,
        )(x2, m, w2, b2)
    else:
        w2 = weight.reshape(1, hidden).astype(compute_dtype)
        b2 = bias.reshape(1, hidden).astype(compute_dtype)
        rows_tile = _choose_rows_tile(rows, hidden, in_b, out_b, tile_budget, two_tc)
        grid = (pl.cdiv(rows, rows_tile),)
        out = pl.pallas_call(
            functools.partial(_ln_kernel, eps=float(eps), inv_h=1.0 / float(hidden),
                              compute_dtype=compute_dtype),
            out_shape=jax.ShapeDtypeStruct((rows, hidden), x.dtype),
            grid_spec=pltpu.PrefetchScalarGridSpec(
                num_scalar_prefetch=0,
                grid=grid,
                in_specs=[
                    pl.BlockSpec((rows_tile, hidden), lambda i: (i, 0)),
                    pl.BlockSpec((1, hidden), lambda i: (0, 0)),      # weight: resident
                    pl.BlockSpec((1, hidden), lambda i: (0, 0)),      # bias:   resident
                ],
                out_specs=pl.BlockSpec((rows_tile, hidden), lambda i: (i, 0)),
            ),
            compiler_params=compiler_params,
        )(x2, w2, b2)

    return out.reshape(orig_shape)


if __name__ == "__main__":
    key = jax.random.PRNGKey(0)
    kx, kw, kb = jax.random.split(key, 3)
    batch, seq, hidden = 2, 8, 32

    x = jax.random.normal(kx, (batch, seq, hidden), dtype=jnp.float32)
    # Module init is ones/zeros; perturb deterministically to also exercise the affine part.
    weight = jnp.ones((hidden,), jnp.float32) + 0.1 * jax.random.normal(kw, (hidden,), jnp.float32)
    bias = jnp.zeros((hidden,), jnp.float32) + 0.05 * jax.random.normal(kb, (hidden,), jnp.float32)

    eps = 1e-12
    y = jax.block_until_ready(layernorm(x, weight, bias, eps=eps))

    # Reference check in plain JAX (matches the PyTorch forward).
    u = jnp.mean(x, axis=-1, keepdims=True)
    s = jnp.mean((x - u) ** 2, axis=-1, keepdims=True)
    ref = weight * ((x - u) / jnp.sqrt(s + eps)) + bias
    assert y.shape == x.shape and y.dtype == x.dtype
    assert jnp.allclose(y, ref, atol=1e-4, rtol=1e-4), "mismatch vs reference"

    print("KERNEL_OK")
</pallas_src>

<mosaic_0001>
module attributes {stable_mosaic.version = 11 : i64} {
  func.func @_ln_packed_kernel(%arg0: i32, %arg1: memref<4x128xf32, #tpu.memory_space<vmem>>, %arg2: memref<128x128xf32, #tpu.memory_space<vmem>>, %arg3: memref<1x128xf32, #tpu.memory_space<vmem>>, %arg4: memref<1x128xf32, #tpu.memory_space<vmem>>, %arg5: memref<4x128xf32, #tpu.memory_space<vmem>>) attributes {dimension_semantics = [#tpu.dimension_semantics<parallel>], iteration_bounds = array<i64: 1>, scalar_prefetch = 0 : i64, scratch_operands = 0 : i64, tpu.core_type = #tpu.core_type<tc>, window_params = [{transform_indices = @transform_0, window_bounds = array<i64: 4, 128>}, {pipeline_mode = #tpu.pipeline_mode<synchronous>, transform_indices = @transform_1, window_bounds = array<i64: 128, 128>}, {pipeline_mode = #tpu.pipeline_mode<synchronous>, transform_indices = @transform_2, window_bounds = array<i64: 1, 128>}, {pipeline_mode = #tpu.pipeline_mode<synchronous>, transform_indices = @transform_3, window_bounds = array<i64: 1, 128>}, {transform_indices = @transform_4, window_bounds = array<i64: 4, 128>}]} {
    %c0 = arith.constant 0 : index
    %c0_0 = arith.constant 0 : index
    %0 = vector.load %arg1[%c0, %c0_0] : memref<4x128xf32, #tpu.memory_space<vmem>>, vector<4x128xf32>
    %c0_1 = arith.constant 0 : index
    %c0_2 = arith.constant 0 : index
    %1 = vector.load %arg2[%c0_1, %c0_2] : memref<128x128xf32, #tpu.memory_space<vmem>>, vector<128x128xf32>
    %cst = arith.constant dense<0.000000e+00> : vector<4x128xf32>
    %2 = tpu.matmul %0, %1, %cst {dimension_numbers = #tpu.dot_dimension_numbers<[1], [0], [0], [1], [0, 0, 1, 1], [], []>} : vector<4x128xf32>, vector<128x128xf32>, vector<4x128xf32> -> vector<4x128xf32>
    %3 = arith.mulf %0, %0 : vector<4x128xf32>
    %cst_3 = arith.constant dense<0.000000e+00> : vector<4x128xf32>
    %4 = tpu.matmul %3, %1, %cst_3 {dimension_numbers = #tpu.dot_dimension_numbers<[1], [0], [0], [1], [0, 0, 1, 1], [], []>} : vector<4x128xf32>, vector<128x128xf32>, vector<4x128xf32> -> vector<4x128xf32>
    %5 = arith.mulf %2, %2 : vector<4x128xf32>
    %6 = arith.subf %4, %5 : vector<4x128xf32>
    %cst_4 = arith.constant 0.000000e+00 : f32
    %7 = vector.broadcast %cst_4 : f32 to vector<4x128xf32>
    %8 = arith.maximumf %6, %7 : vector<4x128xf32>
    %cst_5 = arith.constant 9.99999996E-13 : f32
    %9 = vector.broadcast %cst_5 : f32 to vector<4x128xf32>
    %10 = arith.addf %8, %9 : vector<4x128xf32>
    %11 = math.rsqrt %10 : vector<4x128xf32>
    %12 = arith.subf %0, %2 : vector<4x128xf32>
    %13 = arith.mulf %12, %11 : vector<4x128xf32>
    %c0_6 = arith.constant 0 : index
    %c0_7 = arith.constant 0 : index
    %14 = vector.load %arg3[%c0_6, %c0_7] : memref<1x128xf32, #tpu.memory_space<vmem>>, vector<1x128xf32>
    %15 = vector.broadcast %14 : vector<1x128xf32> to vector<4x128xf32>
    %16 = arith.mulf %13, %15 : vector<4x128xf32>
    %c0_8 = arith.constant 0 : index
    %c0_9 = arith.constant 0 : index
    %17 = vector.load %arg4[%c0_8, %c0_9] : memref<1x128xf32, #tpu.memory_space<vmem>>, vector<1x128xf32>
    %18 = vector.broadcast %17 : vector<1x128xf32> to vector<4x128xf32>
    %19 = arith.addf %16, %18 : vector<4x128xf32>
    %c0_10 = arith.constant 0 : index
    %c0_11 = arith.constant 0 : index
    %20 = vector.load %arg5[%c0_10, %c0_11] : memref<4x128xf32, #tpu.memory_space<vmem>>, vector<4x128xf32>
    tpu.vector_store %arg5[%c0_10, %c0_11], %19 {strides = array<i32>} : memref<4x128xf32, #tpu.memory_space<vmem>>, vector<4x128xf32>,
    return
  }
  func.func @transform_0(%arg0: i32) -> (i32, i32) {
    %c0_i32 = arith.constant 0 : i32
    %c0_i32_0 = arith.constant 0 : i32
    return %arg0, %c0_i32 : i32, i32
  }
  func.func @transform_1(%arg0: i32) -> (i32, i32) {
    %c0_i32 = arith.constant 0 : i32
    %c0_i32_0 = arith.constant 0 : i32
    %c0_i32_1 = arith.constant 0 : i32
    return %c0_i32, %c0_i32_0 : i32, i32
  }
  func.func @transform_2(%arg0: i32) -> (i32, i32) {
    %c0_i32 = arith.constant 0 : i32
    %c0_i32_0 = arith.constant 0 : i32
    %c0_i32_1 = arith.constant 0 : i32
    return %c0_i32, %c0_i32_0 : i32, i32
  }
  func.func @transform_3(%arg0: i32) -> (i32, i32) {
    %c0_i32 = arith.constant 0 : i32
    %c0_i32_0 = arith.constant 0 : i32
    %c0_i32_1 = arith.constant 0 : i32
    return %c0_i32, %c0_i32_0 : i32, i32
  }
  func.func @transform_4(%arg0: i32) -> (i32, i32) {
    %c0_i32 = arith.constant 0 : i32
    %c0_i32_0 = arith.constant 0 : i32
    return %arg0, %c0_i32 : i32, i32
  }
}

</mosaic_0001>

<bundles_post_ra>
// kernel: tile.13
= control target key start
LH: loop header
LB: loop body
LE: loop exit
PB: predicated region body
PF: predicated region fallthrough
CT: control target
= control target key end

     0   :  { %s22_s0 = inlined_call_operand.vmem [shape: f32[32], index: 0, kind: input, shape index: {}]   ;;  %s23_s1 = inlined_call_operand.vmem [shape: f32[4,32], index: 1, kind: output, shape index: {}]  }
   0x1   :  { %v4_v0 = vld [vmem:[%s22_s0] ss:$0 sm:$0xff] }
   0x2   :  { %5 = vst [vmem:[%s23_s1] sm:$0xf] %v4_v0 }

// kernel: tile.14
= control target key start
LH: loop header
LB: loop body
LE: loop exit
PB: predicated region body
PF: predicated region fallthrough
CT: control target
= control target key end

     0   :  { %vm7_vm0 = vcmask 261120   ;;  %s37_s8 = smov 32   ;;  %s38_s9 = smov 64   ;;  %vm13_vm1 = vcmask 1048320   ;;  %vm19_vm2 = vcmask 785920   ;;  %vm25_vm3 = vcmask 523520   ;;  %s55_s0 = inlined_call_operand.vmem [shape: f32[4,32], index: 0, kind: input, shape index: {}]   ;;  %s56_s1 = inlined_call_operand.vmem [shape: f32[1,128], index: 1, kind: output, shape index: {}]  }
   0x1   :  { %v4_v0 = vld [vmem:[%s55_s0] sm:$0xf]  ;;  %s36_s0 = smov 96  }
   0x2   :  { %5 = vst [vmem:[#allocation1] sm:$0xf] %v4_v0 }
   0x9   :  { %v10_v1 = vld [vmem:[#allocation1 + $0x3] sm:$0x1]   ;;  %v22_v2 = vld [vmem:[#allocation1 + $0x1] sm:$0x1]   ;;  %v6_v3 = vld [vmem:[#allocation1] sm:$0x1]  }
   0xa   :  { %11 = vrot.lane.b32.xlu0 %v10_v1, %s36_s0  ;;  %23 = vrot.lane.b32.xlu1 %v22_v2, %s37_s8  ;;  %v16_v4 = vld [vmem:[#allocation1 + $0x2] sm:$0x1]   ;;  %8 = vst.msk [vmem:[#allocation0] sm:$0x1] %vm7_vm0, %v6_v3  }
   0xe   :  { %17 = vrot.lane.b32.xlu0 %v16_v4, %s38_s9 }
  0x7c   :  { %v12_v5 = vpop.permute.xlu0 %11   ;;  %v24_v6 = vpop.permute.xlu1 %23  }
  0x7d   :  { %14 = vst.msk [vmem:[#allocation0] sm:$0x1] %vm13_vm1, %v12_v5  }
  0x80   :  { %v18_v7 = vpop.permute.xlu0 %17  }
  0x81   :  { %20 = vst.msk [vmem:[#allocation0] sm:$0x1] %vm19_vm2, %v18_v7  }
  0x82   :  { %26 = vst.msk [vmem:[#allocation0] sm:$0x1] %vm25_vm3, %v24_v6  }
  0x89   :  { %v30_v8 = vld [vmem:[#allocation0] sm:$0x1] }
  0x8a   :  { %32 = vst [vmem:[%s56_s1] sm:$0x1] %v30_v8 }

// kernel: layernorm.1
= control target key start
LH: loop header
LB: loop body
LE: loop exit
PB: predicated region body
PF: predicated region fallthrough
CT: control target
= control target key end

     0   :  { %9 = vsyncpa [#allocation3], 0  ;;  %s404_s15 = smov [#allocation2]   ;;  %s459_s0 = inlined_call_operand.vmem [shape: f32[4,128], index: 0, kind: input, shape index: {}]   ;;  %s460_s1 = inlined_call_operand.hbm [shape: f32[128,128], index: 1, kind: input, shape index: {}]   ;;  %s461_s2 = inlined_call_operand.vmem [shape: f32[1,128], index: 2, kind: input, shape index: {}]   ;;  %s462_s3 = inlined_call_operand.vmem [shape: f32[1,128], index: 3, kind: input, shape index: {}]   ;;  %s463_s4 = inlined_call_operand.vmem [shape: f32[4,128], index: 4, kind: output, shape index: {}]  }
   0x1   :  { %s17_s16 = sshll.u32 %s404_s15, 4  ;;  %s380_s19 = scalar_lea.hbm %s460_s1, 2048  ;;  %s18_s16 = int_to_ptr.vmem [resolvable:$true] %s17_s16 }
   0x2   :  { %p381_p0 = scmp.ne.s32.totalorder %s460_s1, %s380_s19  ;;  %p384_p1 = scmp.lt.u32.totalorder %s380_s19, %s460_s1 }
   0x4   :  { %p386_p2 = pnand %p384_p1, %p381_p0 }
   0x6   :  { %389 = shalt.err (!%p386_p2)
}
   0x7   :  { %s390_s24 = scalar_lea.vmem %s18_s16, 2048  ;;  %p395_p4 = scmp.lt.s32.totalorder %s18_s16, %s18_s16 }
   0x8   :  { %p391_p3 = scmp.ne.s32.totalorder %s18_s16, %s390_s24  ;;  %p396_p5 = scmp.lt.s32.totalorder %s390_s24, %s390_s24 }
   0xa   :  { %p397_p6 = por %p396_p5, %p395_p4 }
   0xc   :  { %p398_p7 = pnand %p397_p6, %p391_p3 }
   0xe   :  { %401 = shalt.err (!%p398_p7)
}
   0xf   :  { %s405_s25 = smov 128   ;;  %s406_s26 = smov 8  }
  0x10   :  { %23 = dma.hbm_to_vmem [thread:$0]  %s460_s1, 2048, %s18_s16, [#allocation3], %s405_s25, %s405_s25, %s406_s26  }
  0x11   :  { %402 = dma.done.wait [#allocation3], 2048  }
  0x12   :  { %403 = vsyncadd [#allocation3], 4294965248  ;;  %v407_v0 = vmov 0.0|0.0   ;;  %vm408_vm0 = vmmov 0   ;;  %v409_v1 = vmov 0.0   ;;  %v32_v2 = vld [vmem:[#allocation2] sm:$0xff] }
  0x13   :  { %324 = vmatprep.subr.bf16.mxu0 %v407_v0  ;;  %348 = vmatprep.subr.bf16.mxu1 %v407_v0  ;;  %v33_v3 = vld [vmem:[#allocation2 + $0x8] sm:$0xff]  ;;  %v34_v4 = vld [vmem:[#allocation2 + $0x10] sm:$0xff]  ;;  %v35_v6 = vld [vmem:[#allocation2 + $0x18] sm:$0xff] }
  0x14   :  { %286 = vmatprep.mubr.msk.f32.mxu0 %vm408_vm0, %v409_v1  ;;  %321 = vmatprep.mubr.msk.f32.mxu1 %vm408_vm0, %v409_v1  ;;  %v325_v5 = vpack.c.bf16 %v33_v3, %v32_v2  ;;  %v328_v7 = vpack.c.bf16 %v35_v6, %v34_v4  ;;  %v36_v8 = vld [vmem:[#allocation2 + $0x20] sm:$0xff]  ;;  %v37_v9 = vld [vmem:[#allocation2 + $0x28] sm:$0xff]  ;;  %v38_v11 = vld [vmem:[#allocation2 + $0x30] sm:$0xff] }
  0x15   :  { %v331_v10 = vpack.c.bf16 %v37_v9, %v36_v8  ;;  %v39_v12 = vld [vmem:[#allocation2 + $0x38] sm:$0xff]  ;;  %v40_v14 = vld [vmem:[#allocation2 + $0x40] sm:$0xff]  ;;  %v41_v15 = vld [vmem:[#allocation2 + $0x48] sm:$0xff] }
  0x16   :  { %326 = vmatpush3.bf16.msra.mxu0 %v325_v5  ;;  %350 = vmatpush3.bf16.msra.mxu1 %v325_v5  ;;  %v334_v13 = vpack.c.bf16 %v39_v12, %v38_v11  ;;  %v337_v16 = vpack.c.bf16 %v41_v15, %v40_v14  ;;  %v42_v17 = vld [vmem:[#allocation2 + $0x50] sm:$0xff]  ;;  %v43_v18 = vld [vmem:[#allocation2 + $0x58] sm:$0xff]  ;;  %v44_v20 = vld [vmem:[#allocation2 + $0x60] sm:$0xff] }
  0x17   :  { %327 = vmatprep.subr.bf16.mxu0 %v407_v0  ;;  %351 = vmatprep.subr.bf16.mxu1 %v407_v0  ;;  %v340_v19 = vpack.c.bf16 %v43_v18, %v42_v17  ;;  %v45_v21 = vld [vmem:[#allocation2 + $0x68] sm:$0xff]  ;;  %v46_v23 = vld [vmem:[#allocation2 + $0x70] sm:$0xff]  ;;  %v47_v24 = vld [vmem:[#allocation2 + $0x78] sm:$0xff] }
  0x18   :  { %v343_v22 = vpack.c.bf16 %v45_v21, %v44_v20  ;;  %v346_v25 = vpack.c.bf16 %v47_v24, %v46_v23  ;;  %v31_v26 = vld [vmem:[%s459_s0] sm:$0xf] }
  0x19   :  { %v118_v27 = vmul.f32 %v31_v26, %v31_v26  ;;  %v218_v38 = vld [vmem:[%s461_s2] ss:$0 sm:$0xff] }
  0x1a   :  { %329 = vmatpush3.bf16.msra.mxu0 %v328_v7  ;;  %353 = vmatpush3.bf16.msra.mxu1 %v328_v7  ;;  %v219_v40 = vld [vmem:[%s462_s3] ss:$0 sm:$0xff] }
  0x1b   :  { %330 = vmatprep.subr.bf16.mxu0 %v407_v0  ;;  %354 = vmatprep.subr.bf16.mxu1 %v407_v0 }
  0x1e   :  { %332 = vmatpush3.bf16.msra.mxu0 %v331_v10  ;;  %356 = vmatpush3.bf16.msra.mxu1 %v331_v10 }
  0x1f   :  { %333 = vmatprep.subr.bf16.mxu0 %v407_v0  ;;  %357 = vmatprep.subr.bf16.mxu1 %v407_v0 }
  0x22   :  { %335 = vmatpush3.bf16.msra.mxu0 %v334_v13  ;;  %359 = vmatpush3.bf16.msra.mxu1 %v334_v13 }
  0x23   :  { %336 = vmatprep.subr.bf16.mxu0 %v407_v0  ;;  %360 = vmatprep.subr.bf16.mxu1 %v407_v0 }
  0x26   :  { %338 = vmatpush3.bf16.msra.mxu0 %v337_v16  ;;  %362 = vmatpush3.bf16.msra.mxu1 %v337_v16 }
  0x27   :  { %339 = vmatprep.subr.bf16.mxu0 %v407_v0  ;;  %363 = vmatprep.subr.bf16.mxu1 %v407_v0 }
  0x2a   :  { %341 = vmatpush3.bf16.msra.mxu0 %v340_v19  ;;  %365 = vmatpush3.bf16.msra.mxu1 %v340_v19 }
  0x2b   :  { %342 = vmatprep.subr.bf16.mxu0 %v407_v0  ;;  %366 = vmatprep.subr.bf16.mxu1 %v407_v0 }
  0x2e   :  { %344 = vmatpush3.bf16.msra.mxu0 %v343_v22  ;;  %368 = vmatpush3.bf16.msra.mxu1 %v343_v22 }
  0x2f   :  { %345 = vmatprep.subr.bf16.mxu0 %v407_v0  ;;  %369 = vmatprep.subr.bf16.mxu1 %v407_v0 }
  0x32   :  { %347 = vmatpush3.bf16.msra.mxu0 %v346_v25  ;;  %371 = vmatpush3.bf16.msra.mxu1 %v346_v25 }
  0x35   :  { %287 = vmatmul.mubr.f32.vlgmr.msra.gmra.mrb[0].mxu0 %v31_v26  ;;  %322 = vmatmul.mubr.f32.vlgmr.msra.gmra.mrb[0].mxu1 %v118_v27 }
 0x108   :  { %v114_v28 = vpop.f32.mrb[0].mxu0  ;;  %v185_v29 = vpop.f32.mrb[0].mxu1 }
 0x109   :  { %v189_v30 = vmul.f32 %v114_v28, %v114_v28  ;;  %v288_v31 = vpop.f32.mrb[1].mxu0  ;;  %v323_v32 = vpop.f32.mrb[1].mxu1  ;;  %v194_v36 = vsub.f32 %v31_v26, %v114_v28 }
 0x10b   :  { %v190_v33 = vsub.f32 %v185_v29, %v189_v30 }
 0x10d   :  { %v191_v34 = vmax.f32 %v190_v33, 0.0 }
 0x10f   :  { %v192_v35 = vadd.f32 1e-12, %v191_v34 }
 0x111   :  { %378 = vrsqrt.f32 %v192_v35 }
 0x11b   :  { %v379_v37 = vpop.eup %378 }
 0x11c   :  { %v195_v39 = vmul.f32 %v379_v37, %v194_v36 }
 0x11e   :  { %v203_v41 = vmul.f32 %v218_v38, %v195_v39 }
 0x120   :  { %v211_v42 = vadd.f32 %v219_v40, %v203_v41 }
 0x122   :  { %212 = vst [vmem:[%s463_s4] sm:$0xf] %v211_v42 }
 0x123   :  { %217 = vsyncpa [#allocation3], 1 }

</bundles_post_ra>
